<compile_context>
chip_gen: v7x
topology: tpu7x:2x2x1
jax: 0.10.0
libtpu: 0.0.40
codegen_flags: <defaults>
</compile_context>

<pallas_src>
import functools
import math

import jax
import jax.numpy as jnp
from jax.experimental import pallas as pl
from jax.experimental.pallas import tpu as pltpu


def _cdiv(a, b):
    return -(-a // b)


def _round_up(x, m):
    return _cdiv(x, m) * m


def _wsl1_kernel(*refs, beta, has_cw, has_w):
    """refs = (x, t, [cw], [w_split, e_onehot], out)
       x/t/out: (1, TS, L);  cw: (1, 1, L) f32;  w_split: (1, TS, 3R) bf16;  e: (3R, L) bf16."""
    x_ref, t_ref = refs[0], refs[1]
    o_ref = refs[-1]
    idx = 2
    if has_cw:
        cw_ref = refs[idx]
        idx += 1
    if has_w:
        w_ref, e_ref = refs[idx], refs[idx + 1]

    x = x_ref[...].astype(jnp.float32)
    t = t_ref[...].astype(jnp.float32)
    t = jnp.where(jnp.isnan(t), x, t)               # NaN target -> zero diff -> zero loss
    diff = x - t
    if has_cw:
        diff = diff * cw_ref[...]
    n = jnp.abs(diff)
    if beta < 1e-5:                                  # static (trace-time) branch
        loss = n
    else:
        loss = jnp.where(n < beta, (0.5 / beta) * (n * n), n - 0.5 * beta)
    if has_w:
        # Expand per-anchor weights across the R*C lane axis with a single DEFAULT-precision
        # bf16 MXU pass.  w_ref holds the exact 3-way bf16 split of the f32 weights and
        # e_ref the 0/1 one-hot matrix stacked 3x along K, so the f32 accumulation
        # reconstructs the f32 weight exactly (one nonzero term per split per lane).
        w_exp = jnp.dot(w_ref[0], e_ref[...], preferred_element_type=jnp.float32)
        loss = loss * w_exp[None, :, :]
    o_ref[...] = loss.astype(o_ref.dtype)


def _vmem_limit_bytes():
    # v7x has only 64 MiB physical VMEM (v5e/v6e: 128 MiB); stay well inside it and fall
    # back to the v7x number if the query is unavailable.
    cap = 64 * 1024 * 1024
    try:
        info = pltpu.get_tpu_info()
        cap = int(getattr(info, "vmem_capacity_bytes", cap)) or cap
    except Exception:
        pass
    return max(min((cap * 3) // 4, 96 * 1024 * 1024), 32 * 1024 * 1024)


def weighted_smooth_l1_loss(inputs, targets, weights=None, code_weights=None,
                            beta: float = 1.0 / 9.0):
    """inputs/targets: (B, A, C); weights: (B, A) or None; code_weights: (C,) or None.
    Returns the unreduced (B, A, C) loss in the input dtype (matches the PyTorch module)."""
    inputs = jnp.asarray(inputs)
    targets = jnp.asarray(targets)
    assert inputs.ndim == 3 and inputs.shape == targets.shape
    B, A, C = inputs.shape
    out_dtype = inputs.dtype
    has_cw = code_weights is not None
    has_w = weights is not None

    # Lane-dense grouping: R anchors per row so lane width L = R*C is a multiple of 128.
    R = math.lcm(C, 128) // C
    L = R * C
    A_r = _round_up(A, R)
    pad = A_r - A
    if pad:
        # Only when A % R != 0: pad at most R-1 anchors (zero input/target/weight gives
        # exactly zero loss rows, sliced off at the end).
        # TODO(synk): a copy-free ragged-anchor epilogue would avoid even this small pad.
        inputs = jnp.pad(inputs, ((0, 0), (0, pad), (0, 0)))
        targets = jnp.pad(targets, ((0, 0), (0, pad), (0, 0)))
    G = A_r // R

    # Free (row-major) reshapes: (B, A_r, C) -> (B, G, L).
    x3 = inputs.reshape(B, G, L)
    t3 = targets.reshape(B, G, L)

    # ---- Tile-size selection (dtype- and generation-aware) ------------------------------
    itemsize = jnp.dtype(out_dtype).itemsize
    w_row_bytes = 2 * _round_up(3 * R, 128) if has_w else 0          # bf16, lane-padded
    row_bytes = 3 * L * itemsize + w_row_bytes                       # in + tgt + out (+ w)
    vmem_limit = _vmem_limit_bytes()
    budget = (vmem_limit * 7) // 8                                   # headroom for E/internal
    ts_budget = max(16, (budget // (2 * row_bytes)) // 16 * 16)      # double-buffered
    # Keep >= ~8 grid blocks so both v7x TensorCores stay busy and the pipeline has depth.
    tiles_per_batch = _cdiv(8, B)
    ts_blocks = _round_up(_cdiv(G, tiles_per_batch), 16)
    TS = max(16, min(ts_budget, 8192, ts_blocks))
    if TS >= G:
        TS = G                      # full-extent block: no ragged tail, any G allowed
    grid = (B, _cdiv(G, TS))        # ragged last block handled by clamped DMA (no padding)

    data_spec = pl.BlockSpec((1, TS, L), lambda b, g: (b, g, 0))
    operands = [x3, t3]
    in_specs = [data_spec, data_spec]

    if has_cw:
        cw = jnp.asarray(code_weights, jnp.float32).reshape(C)
        cw_row = jnp.tile(cw, R).reshape(1, 1, L)                    # code weights per lane
        operands.append(cw_row)
        in_specs.append(pl.BlockSpec((1, 1, L), lambda b, g: (0, 0, 0)))

    if has_w:
        w = jnp.asarray(weights, jnp.float32)
        assert w.shape == (B, A)
        if pad:
            w = jnp.pad(w, ((0, 0), (0, pad)))
        w = w.reshape(B, G, R)
        # Exact 3-way bf16 split of the f32 weights (host-side, tiny vs. the data tensors).
        w1 = w.astype(jnp.bfloat16)
        r1 = w - w1.astype(jnp.float32)
        w2 = r1.astype(jnp.bfloat16)
        w3 = (r1 - w2.astype(jnp.float32)).astype(jnp.bfloat16)
        w_split = jnp.concatenate([w1, w2, w3], axis=-1)             # (B, G, 3R) bf16
        # One-hot expansion matrix stacked 3x along K: E3[k, l] = 1 iff (k % R) == l // C.
        lane_group = jnp.arange(L, dtype=jnp.int32) // C             # (L,)
        part_group = jnp.arange(3 * R, dtype=jnp.int32) % R          # (3R,)
        e3 = (part_group[:, None] == lane_group[None, :]).astype(jnp.bfloat16)
        operands += [w_split, e3]
        in_specs += [pl.BlockSpec((1, TS, 3 * R), lambda b, g: (b, g, 0)),
                     pl.BlockSpec((3 * R, L), lambda b, g: (0, 0))]

    kernel = functools.partial(_wsl1_kernel, beta=float(beta), has_cw=has_cw, has_w=has_w)

    out3 = pl.pallas_call(
        kernel,
        out_shape=jax.ShapeDtypeStruct((B, G, L), out_dtype),
        grid_spec=pltpu.PrefetchScalarGridSpec(
            num_scalar_prefetch=0,
            grid=grid,
            in_specs=in_specs,
            out_specs=pl.BlockSpec((1, TS, L), lambda b, g: (b, g, 0)),
        ),
        compiler_params=pltpu.CompilerParams(
            dimension_semantics=("parallel", "parallel"),
            vmem_limit_bytes=vmem_limit,
        ),
    )(*operands)

    out = out3.reshape(B, A_r, C)
    if pad:
        out = out[:, :A, :]
    return out


def _reference(x, t, w, cw, beta):
    t = jnp.where(jnp.isnan(t), x, t)
    d = x - t
    if cw is not None:
        d = d * cw.reshape(1, 1, -1)
    n = jnp.abs(d)
    loss = n if beta < 1e-5 else jnp.where(n < beta, 0.5 * n * n / beta, n - 0.5 * beta)
    if w is not None:
        loss = loss * w[..., None]
    return loss


if __name__ == "__main__":
    key = jax.random.PRNGKey(0)
    beta = 1.0 / 9.0

    def check(B, A, C, use_w, use_cw, keys):
        k1, k2, k3 = keys
        x = jax.random.normal(k1, (B, A, C), jnp.float32)
        t = jax.random.normal(k2, (B, A, C), jnp.float32)
        t = t.at[0, 0, 0].set(jnp.nan).at[B - 1, A // 2, C - 1].set(jnp.nan)
        w = jax.random.uniform(k3, (B, A), jnp.float32) if use_w else None
        cw = jnp.linspace(0.5, 1.5, C, dtype=jnp.float32) if use_cw else None
        out = jax.block_until_ready(weighted_smooth_l1_loss(x, t, w, cw, beta))
        ref = _reference(x, t, w, cw, beta)
        assert out.shape == (B, A, C)
        assert not bool(jnp.any(jnp.isnan(out))), "unexpected NaNs in output"
        assert jnp.allclose(out, ref, atol=1e-6, rtol=1e-5), (B, A, C, use_w, use_cw)

    ks = jax.random.split(key, 9)
    # Aligned case: A % R == 0 -> no host-side padding, no output slice copy.
    check(2, 112, 8, True, True, ks[0:3])
    # Ragged case: A % R != 0 and G % TS != 0 -> exercises the small anchor pad and the
    # clamped (ragged) last grid block.
    check(2, 1000, 8, True, True, ks[3:6])
    # Specialized case: no per-anchor weights and no code weights (no extra operands).
    check(2, 112, 8, False, False, ks[6:9])

    print("KERNEL_OK")
</pallas_src>

<mosaic_0001>
module attributes {stable_mosaic.version = 11 : i64} {
  func.func @_wsl1_kernel(%arg0: i32, %arg1: i32, %arg2: memref<1x7x128xf32, #tpu.memory_space<vmem>>, %arg3: memref<1x7x128xf32, #tpu.memory_space<vmem>>, %arg4: memref<1x1x128xf32, #tpu.memory_space<vmem>>, %arg5: memref<1x7x48xbf16, #tpu.memory_space<vmem>>, %arg6: memref<48x128xbf16, #tpu.memory_space<vmem>>, %arg7: memref<1x7x128xf32, #tpu.memory_space<vmem>>) attributes {dimension_semantics = [#tpu.dimension_semantics<parallel>, #tpu.dimension_semantics<parallel>], iteration_bounds = array<i64: 2, 1>, scalar_prefetch = 0 : i64, scratch_operands = 0 : i64, tpu.core_type = #tpu.core_type<tc>, window_params = [{transform_indices = @transform_0, window_bounds = array<i64: 1, 7, 128>}, {transform_indices = @transform_1, window_bounds = array<i64: 1, 7, 128>}, {pipeline_mode = #tpu.pipeline_mode<synchronous>, transform_indices = @transform_2, window_bounds = array<i64: 1, 1, 128>}, {transform_indices = @transform_3, window_bounds = array<i64: 1, 7, 48>}, {pipeline_mode = #tpu.pipeline_mode<synchronous>, transform_indices = @transform_4, window_bounds = array<i64: 48, 128>}, {transform_indices = @transform_5, window_bounds = array<i64: 1, 7, 128>}]} {
    %c0 = arith.constant 0 : index
    %c0_0 = arith.constant 0 : index
    %c0_1 = arith.constant 0 : index
    %0 = vector.load %arg2[%c0, %c0_0, %c0_1] : memref<1x7x128xf32, #tpu.memory_space<vmem>>, vector<1x7x128xf32>
    %c0_2 = arith.constant 0 : index
    %c0_3 = arith.constant 0 : index
    %c0_4 = arith.constant 0 : index
    %1 = vector.load %arg3[%c0_2, %c0_3, %c0_4] : memref<1x7x128xf32, #tpu.memory_space<vmem>>, vector<1x7x128xf32>
    %2 = arith.cmpf one, %1, %1 : vector<1x7x128xf32>
    %3 = arith.select %2, %0, %1 : vector<1x7x128xi1>, vector<1x7x128xf32>
    %4 = arith.subf %0, %3 : vector<1x7x128xf32>
    %c0_5 = arith.constant 0 : index
    %c0_6 = arith.constant 0 : index
    %c0_7 = arith.constant 0 : index
    %5 = vector.load %arg4[%c0_5, %c0_6, %c0_7] : memref<1x1x128xf32, #tpu.memory_space<vmem>>, vector<1x1x128xf32>
    %6 = vector.broadcast %5 : vector<1x1x128xf32> to vector<1x7x128xf32>
    %7 = arith.mulf %4, %6 : vector<1x7x128xf32>
    %8 = math.absf %7 : vector<1x7x128xf32>
    %cst = arith.constant 0.111111112 : f32
    %9 = vector.broadcast %cst : f32 to vector<1x7x128xf32>
    %10 = arith.cmpf olt, %8, %9 : vector<1x7x128xf32>
    %11 = arith.mulf %8, %8 : vector<1x7x128xf32>
    %cst_8 = arith.constant 4.500000e+00 : f32
    %12 = vector.broadcast %cst_8 : f32 to vector<1x7x128xf32>
    %13 = arith.mulf %12, %11 : vector<1x7x128xf32>
    %cst_9 = arith.constant 0.055555556 : f32
    %14 = vector.broadcast %cst_9 : f32 to vector<1x7x128xf32>
    %15 = arith.subf %8, %14 : vector<1x7x128xf32>
    %16 = arith.select %10, %13, %15 : vector<1x7x128xi1>, vector<1x7x128xf32>
    %c0_10 = arith.constant 0 : index
    %c0_11 = arith.constant 0 : index
    %c0_12 = arith.constant 0 : index
    %17 = vector.load %arg5[%c0_10, %c0_11, %c0_12] : memref<1x7x48xbf16, #tpu.memory_space<vmem>>, vector<1x7x48xbf16>
    %18 = vector.shape_cast %17 : vector<1x7x48xbf16> to vector<7x48xbf16>
    %c0_13 = arith.constant 0 : index
    %c0_14 = arith.constant 0 : index
    %19 = vector.load %arg6[%c0_13, %c0_14] : memref<48x128xbf16, #tpu.memory_space<vmem>>, vector<48x128xbf16>
    %cst_15 = arith.constant dense<0.000000e+00> : vector<7x128xf32>
    %20 = tpu.matmul %18, %19, %cst_15 {dimension_numbers = #tpu.dot_dimension_numbers<[1], [0], [0], [1], [0, 0, 1, 1], [], []>} : vector<7x48xbf16>, vector<48x128xbf16>, vector<7x128xf32> -> vector<7x128xf32>
    %21 = vector.shape_cast %20 : vector<7x128xf32> to vector<1x7x128xf32>
    %22 = arith.mulf %16, %21 : vector<1x7x128xf32>
    %c0_16 = arith.constant 0 : index
    %c0_17 = arith.constant 0 : index
    %c0_18 = arith.constant 0 : index
    %23 = vector.load %arg7[%c0_16, %c0_17, %c0_18] : memref<1x7x128xf32, #tpu.memory_space<vmem>>, vector<1x7x128xf32>
    tpu.vector_store %arg7[%c0_16, %c0_17, %c0_18], %22 {strides = array<i32>} : memref<1x7x128xf32, #tpu.memory_space<vmem>>, vector<1x7x128xf32>,
    return
  }
  func.func @transform_0(%arg0: i32, %arg1: i32) -> (i32, i32, i32) {
    %c0_i32 = arith.constant 0 : i32
    %c0_i32_0 = arith.constant 0 : i32
    return %arg0, %arg1, %c0_i32 : i32, i32, i32
  }
  func.func @transform_1(%arg0: i32, %arg1: i32) -> (i32, i32, i32) {
    %c0_i32 = arith.constant 0 : i32
    %c0_i32_0 = arith.constant 0 : i32
    return %arg0, %arg1, %c0_i32 : i32, i32, i32
  }
  func.func @transform_2(%arg0: i32, %arg1: i32) -> (i32, i32, i32) {
    %c0_i32 = arith.constant 0 : i32
    %c0_i32_0 = arith.constant 0 : i32
    %c0_i32_1 = arith.constant 0 : i32
    %c0_i32_2 = arith.constant 0 : i32
    return %c0_i32, %c0_i32_0, %c0_i32_1 : i32, i32, i32
  }
  func.func @transform_3(%arg0: i32, %arg1: i32) -> (i32, i32, i32) {
    %c0_i32 = arith.constant 0 : i32
    %c0_i32_0 = arith.constant 0 : i32
    return %arg0, %arg1, %c0_i32 : i32, i32, i32
  }
  func.func @transform_4(%arg0: i32, %arg1: i32) -> (i32, i32) {
    %c0_i32 = arith.constant 0 : i32
    %c0_i32_0 = arith.constant 0 : i32
    %c0_i32_1 = arith.constant 0 : i32
    return %c0_i32, %c0_i32_0 : i32, i32
  }
  func.func @transform_5(%arg0: i32, %arg1: i32) -> (i32, i32, i32) {
    %c0_i32 = arith.constant 0 : i32
    %c0_i32_0 = arith.constant 0 : i32
    return %arg0, %arg1, %c0_i32 : i32, i32, i32
  }
}

</mosaic_0001>

<bundles_post_ra>
// kernel: tpu_custom_call.1
= control target key start
LH: loop header
LB: loop body
LE: loop exit
PB: predicated region body
PF: predicated region fallthrough
CT: control target
= control target key end

     0   :  { %s618_s18 = smov 0   ;;  %s620_s19 = smov 0   ;;  %s669_s0 = inlined_call_operand.vmem [shape: f32[2,7,128], index: 0, kind: input, shape index: {}]   ;;  %s670_s1 = inlined_call_operand.vmem [shape: f32[2,7,128], index: 1, kind: input, shape index: {}]   ;;  %s671_s2 = inlined_call_operand.vmem [shape: f32[1,1,128], index: 2, kind: input, shape index: {}]   ;;  %s672_s3 = inlined_call_operand.vmem [shape: bf16[2,7,48], index: 3, kind: input, shape index: {}]   ;;  %s673_s4 = inlined_call_operand.vmem [shape: bf16[48,128], index: 4, kind: input, shape index: {}]   ;;  %s674_s5 = inlined_call_operand.vmem [shape: f32[2,7,128], index: 5, kind: output, shape index: {}]  }
   0x1   :  { %s622_s20 = smov 0  }
   0x2 LB: > { %s27_s21 = sadd.s32 1, %s580_s19  ;;  %p506_p0 = scmp.ge.s32.totalorder %s584_s20, 1  ;;  %s584_s20 = sphi %s622_s20, %s15_s20   ;;  %s580_s19 = sphi %s620_s19, %s676_s19   ;;  %s576_s18 = sphi %s618_s18, %s675_s18  }
   0x3   : > { %p29_p1 = scmp.ge.s32.totalorder %s27_s21, 2  ;;  %p233_p2 = scmp.lt.s32.totalorder %s584_s20, 3 }
   0x5   : > { %s678_s21 = smov (%p29_p1, %s27_s21), 0  ;;  %p234_p3 = pnand %p506_p0, %p233_p2 }
   0x6   : > { %v559_v0 = vld [vmem:[%s673_s4] sm:$0xff] (!%p234_p3)   ;;  %v586_v1 = vmov (!%p234_p3), 0.0   ;;  %v560_v2 = vld [vmem:[%s673_s4 + $0x8] sm:$0xff] (!%p234_p3)   ;;  %vm587_vm0 = vmmov (!%p234_p3), 0   ;;  %p279_p4 = scmp.lt.s32.totalorder (!%p234_p3), %s576_s18, 1  ;;  %v561_v3 = vld [vmem:[%s673_s4 + $0x10] sm:$0xff] (!%p234_p3)  }
   0x7   : > { %237 = sbr.rel (%p234_p3) target bundleno = 234 (0xea), region = 40  ;;  %523 = vmatprep.subr.bf16.mxu0 (!%p234_p3), %v586_v1  ;;  %529 = vmatprep.mubr.msk.bf16.mxu0 (!%p234_p3), %vm587_vm0, %v586_v1  ;;  %vm352_vm1 = vcmask (!%p234_p3), 392192   ;;  %v511_v9 = vld [vmem:[%s671_s2] ss:$0 sm:$0xff] (!%p234_p3) }
   0x8   : > { %524 = vmatpush3.bf16.msra.mxu0 (!%p234_p3), %v559_v0 }
   0x9   : > { %525 = vmatprep.subr.bf16.mxu0 (!%p234_p3), %v586_v1 }
   0xc   : > { %526 = vmatpush3.bf16.msra.mxu0 (!%p234_p3), %v560_v2 }
   0xd   : > { %527 = vmatprep.subr.bf16.mxu0 (!%p234_p3), %v586_v1 }
   0xe   : > { %s680_s18 = smov (!%p279_p4, %s576_s18), 1 }
   0xf   : > { %s509_s28 = sshll.u32 %s680_s18, 2  ;;  %s507_s7 = sshll.u32 %s680_s18, 3 }
  0x10   : > { %s299_s6 = scalar_lea.vmem %s672_s3, %s509_s28  ;;  %528 = vmatpush3.bf16.msra.mxu0 %v561_v3  ;;  %s292_s10 = scalar_lea.vmem %s670_s1, %s507_s7 }
  0x11   : > { %v327_v4 = vld [vmem:[%s299_s6] sm:$0xf]  ;;  %s285_s13 = scalar_lea.vmem %s669_s0, %s507_s7  ;;  %s306_s18 = scalar_lea.vmem %s674_s5, %s507_s7 }
  0x12   : > { %v309_v5 = vld [vmem:[%s292_s10] sm:$0x7f] }
  0x13   : > { %530 = vmatmul.mubr.msk.bf16.vlgmr.msra.gmra.mrb[0].mxu0 %vm352_vm1, %v327_v4  ;;  %v308_v6 = vld [vmem:[%s285_s13] sm:$0x7f]  ;;  %vm310_vm2 = vcmp.ne.f32.partialorder %v309_v5, %v309_v5 }
  0x14   : > { %v311_v7 = vsel %vm310_vm2, %v308_v6, %v309_v5 }
  0x15   : > { %v312_v8 = vsub.f32 %v308_v6, %v311_v7 }
  0x17   : > { %v320_v10 = vmul.f32 %v511_v9, %v312_v8 }
  0x19   : > { %v321_v11 = vand.u32 2147483647, %v320_v10 }
  0x1b   : > { %v323_v12 = vmul.f32 %v321_v11, %v321_v11  ;;  %v512_v14 = vadd.f32 -0.055555556, %v321_v11  ;;  %vm322_vm3 = vcmp.lt.f32.partialorder %v321_v11, 0.11111111 }
  0x1d   : > { %v324_v13 = vmul.f32 4.5, %v323_v12 }
  0x1f   : > { %v326_v15 = vsel %vm322_vm3, %v324_v13, %v512_v14 }
  0xe6   : > { %v390_v16 = vpop.f32.mrb[0].mxu0 }
  0xe7   : > { %v396_v17 = vmul.f32 %v390_v16, %v326_v15  ;;  %v531_v18 = vpop.f32.mrb[1].mxu0 }
  0xe8   : > { %v393_v19 = vpop.f32.mrb[2].mxu0 }
  0xe9   : > { %397 = vst [vmem:[%s306_s18] sm:$0x7f] %v396_v17  ;;  %v532_v20 = vpop.f32.mrb[3].mxu0 }
  0xea PF: > { %s15_s20 = sadd.s32 1, %s584_s20   ;;  %s675_s18 = smov %s580_s19 }
  0xeb   : > { %p12_p5 = scmp.ge.s32.totalorder %s15_s20, 4   ;;  %s676_s19 = smov %s678_s21 }
  0xed   :  { %14 = sbr.rel (!%p12_p5) target bundleno = 2 (0x2), region = 76 }

</bundles_post_ra>
